<compile_context>
chip_gen: v5e
topology: v5e:2x2
jax: 0.10.0
libtpu: 0.0.40
codegen_flags: <defaults>
</compile_context>

<pallas_src>
import functools

import jax
import jax.numpy as jnp
from jax.experimental import pallas as pl
from jax.experimental.pallas import tpu as pltpu

CLS_PAD = 128  # out_obj logits padded to a full 128-lane vreg width


# ----------------------------------------------------------------------------
# Fused Pallas kernel (object stream + both edge streams, one launch)
# ----------------------------------------------------------------------------


def _fused_forward_kernel(box_ref, roi_ref, uprd_ref, utpt_ref,
                          bw1_ref, bb1_ref, bw2_ref, bb2_ref,
                          wov_roi_ref, wov_pos_ref, bov_ref,
                          wout_ref, bout_ref,
                          wv_roi_ref, wv_feat_ref, bv_ref,
                          wf_sbj_ref, wf_obj_ref, wf_uni_ref, bft_ref,
                          wp_ref, bp_ref,
                          dists_ref, prd_ref, head_ref, tail_ref, uni_ref):
    """One launch computing:
         pos    = bbox_embed(box_info)            (Linear+ReLU x2; Dropout=identity in eval)
         feats  = lin_obj_visual([roi, pos])      (split-weight accumulation, no concat)
         dists  = out_obj(feats)                  (weights zero-padded to 128 lanes)
         vis2h  = lin_edge_visual_tpt([roi, feats])
         head/tail = tpt_init_fusion_vis sbj/obj halves applied per-object
         uni    = tpt_init_fusion_vis union half (union_tpt) + bias
         prd    = prd_init_fusion(union_prd)      (== edge_ctx_prd under identity encoder)
       MXU inputs bf16; accumulation / bias / ReLU in f32.
    """
    f32, bf16 = jnp.float32, jnp.bfloat16
    H = wf_sbj_ref.shape[0]

    # ---- object stream ----------------------------------------------------
    h1 = jnp.dot(box_ref[...].astype(bf16), bw1_ref[...], preferred_element_type=f32)
    h1 = jnp.maximum(h1 + bb1_ref[...], 0.0)
    pos = jnp.dot(h1.astype(bf16), bw2_ref[...], preferred_element_type=f32)
    pos = jnp.maximum(pos + bb2_ref[...], 0.0)

    roi = roi_ref[...]                                        # bf16, reused by both streams
    feats = (jnp.dot(roi, wov_roi_ref[...], preferred_element_type=f32)
             + jnp.dot(pos.astype(bf16), wov_pos_ref[...], preferred_element_type=f32)
             + bov_ref[...])

    # TODO(synk): SHA_Encoder (context_obj) is not defined in the reference module;
    # treated as identity on the visual stream (obj_feats = obj_pre_rep_vis).
    feats_bf = feats.astype(bf16)
    dists_ref[...] = (jnp.dot(feats_bf, wout_ref[...], preferred_element_type=f32)
                      + bout_ref[...])

    # ---- edge stream: tpt -------------------------------------------------
    vis2h = (jnp.dot(roi, wv_roi_ref[...], preferred_element_type=f32)
             + jnp.dot(feats_bf, wv_feat_ref[...], preferred_element_type=f32)
             + bv_ref[...])                                   # [N, 2H]
    head = vis2h[:, :H].astype(bf16)                          # 128-aligned lane slices
    tail = vis2h[:, H:].astype(bf16)
    head_ref[...] = jnp.dot(head, wf_sbj_ref[...], preferred_element_type=f32)
    tail_ref[...] = jnp.dot(tail, wf_obj_ref[...], preferred_element_type=f32)
    uni_ref[...] = (jnp.dot(utpt_ref[...], wf_uni_ref[...], preferred_element_type=f32)
                    + bft_ref[...])

    # ---- edge stream: prd -------------------------------------------------
    # TODO(synk): PredicateEntityEncoder / SHA_Encoder (context_edge_prd / _tpt) are
    # not defined in the reference module; identity on the predicate / visual stream.
    prd_ref[...] = (jnp.dot(uprd_ref[...], wp_ref[...], preferred_element_type=f32)
                    + bp_ref[...])


# ----------------------------------------------------------------------------
# pallas_call wrapper
# ----------------------------------------------------------------------------


def fused_forward_call(params, box_info, roi_bf, uprd_bf, utpt_bf):
    N, _ = roi_bf.shape
    E = uprd_bf.shape[0]
    H = params["wf_sbj"].shape[0]
    full = lambda a: pl.BlockSpec(a.shape, lambda i: (0, 0))  # whole array, every step
    p = params
    return pl.pallas_call(
        _fused_forward_kernel,
        out_shape=(jax.ShapeDtypeStruct((N, CLS_PAD), jnp.float32),   # obj_dists (padded)
                   jax.ShapeDtypeStruct((E, H), jnp.float32),         # edge_ctx_prd
                   jax.ShapeDtypeStruct((N, H), jnp.float32),         # per-object head projection
                   jax.ShapeDtypeStruct((N, H), jnp.float32),         # per-object tail projection
                   jax.ShapeDtypeStruct((E, H), jnp.float32)),        # per-edge union part (+bias)
        grid=(1,),
        in_specs=[
            full(box_info), full(roi_bf), full(uprd_bf), full(utpt_bf),
            full(p["bbox_w1"]), full(p["bbox_b1"]), full(p["bbox_w2"]), full(p["bbox_b2"]),
            full(p["wov_roi"]), full(p["wov_pos"]), full(p["bov"]),
            full(p["wout_pad"]), full(p["bout_pad"]),
            full(p["wv_roi"]), full(p["wv_feat"]), full(p["bv"]),
            full(p["wf_sbj"]), full(p["wf_obj"]), full(p["wf_uni"]), full(p["bft"]),
            full(p["wp"]), full(p["bp"]),
        ],
        out_specs=(pl.BlockSpec((N, CLS_PAD), lambda i: (0, 0)),
                   pl.BlockSpec((E, H), lambda i: (0, 0)),
                   pl.BlockSpec((N, H), lambda i: (0, 0)),
                   pl.BlockSpec((N, H), lambda i: (0, 0)),
                   pl.BlockSpec((E, H), lambda i: (0, 0))),
        compiler_params=pltpu.CompilerParams(dimension_semantics=("arbitrary",)),
    )(box_info, roi_bf, uprd_bf, utpt_bf,
      p["bbox_w1"], p["bbox_b1"], p["bbox_w2"], p["bbox_b2"],
      p["wov_roi"], p["wov_pos"], p["bov"],
      p["wout_pad"], p["bout_pad"],
      p["wv_roi"], p["wv_feat"], p["bv"],
      p["wf_sbj"], p["wf_obj"], p["wf_uni"], p["bft"],
      p["wp"], p["bp"])


# ----------------------------------------------------------------------------
# Parameter construction (deterministic; splits / padding / bf16 cast hoisted here)
# ----------------------------------------------------------------------------


def _init_linear(key, in_f, out_f):
    """nn.Linear(in_f, out_f); weight stored already transposed to [in, out]."""
    kw, kb = jax.random.split(key)
    w = jax.random.normal(kw, (in_f, out_f), jnp.float32) * 0.02
    b = jax.random.normal(kb, (out_f,), jnp.float32) * 0.01
    return w, b


def make_params(key, num_obj_cls, in_channels, hidden_dim, compress_dim):
    bf16 = jnp.bfloat16
    H, Cin, Dc = hidden_dim, in_channels, compress_dim
    keys = jax.random.split(key, 7)

    bw1, bb1 = _init_linear(keys[0], 9, 32)                # bbox_embed[0]
    bw2, bb2 = _init_linear(keys[1], 32, 128)              # bbox_embed[3]
    wov, bov = _init_linear(keys[2], Cin + 128, H)         # lin_obj_visual
    wout, bout = _init_linear(keys[3], H, num_obj_cls)     # out_obj
    wv, bv = _init_linear(keys[4], Cin + H, 2 * H)         # lin_edge_visual_tpt
    wf, bft = _init_linear(keys[5], 2 * H + Dc, H)         # tpt_init_fusion_vis
    wp, bp = _init_linear(keys[6], Dc, H)                  # prd_init_fusion

    # zero-pad out_obj to 128 output lanes (sliced back to num_obj_cls in wrapper)
    wout_pad = jnp.zeros((H, CLS_PAD), jnp.float32).at[:, :num_obj_cls].set(wout)
    bout_pad = jnp.zeros((CLS_PAD,), jnp.float32).at[:num_obj_cls].set(bout)

    # TODO(synk): obj_embed1/obj_embed_prd/obj_embed_tpt (GloVe tables), lin_obj_textual,
    # lin_edge_visual_obj, lin_edge_visual_predicate, lin_edge_textual_tpt and
    # tpt_init_fusion_txt only feed the textual/entity streams of SHA_Encoder /
    # PredicateEntityEncoder, which are not defined in the reference module and are
    # stand-in'd as identity on their primary stream -> those weights are dead code
    # and are omitted here.
    return {
        "bbox_w1": bw1.astype(bf16), "bbox_b1": bb1.reshape(1, -1),
        "bbox_w2": bw2.astype(bf16), "bbox_b2": bb2.reshape(1, -1),
        "wov_roi": wov[:Cin].astype(bf16), "wov_pos": wov[Cin:].astype(bf16),
        "bov": bov.reshape(1, -1),
        "wout_pad": wout_pad.astype(bf16), "bout_pad": bout_pad.reshape(1, -1),
        "wv_roi": wv[:Cin].astype(bf16), "wv_feat": wv[Cin:].astype(bf16),
        "bv": bv.reshape(1, -1),
        "wf_sbj": wf[:H].astype(bf16), "wf_obj": wf[H:2 * H].astype(bf16),
        "wf_uni": wf[2 * H:].astype(bf16), "bft": bft.reshape(1, -1),
        "wp": wp.astype(bf16), "bp": bp.reshape(1, -1),
    }


# ----------------------------------------------------------------------------
# Forward pass (1 fused Pallas launch + jitted glue)
# ----------------------------------------------------------------------------


def encode_box_info(boxes_list, img_sizes):
    """Per-image xyxy boxes -> 9-dim normalised geometry features (as in the repo)."""
    infos = []
    for boxes, (wid, hei) in zip(boxes_list, img_sizes):
        wh = boxes[:, 2:4] - boxes[:, 0:2] + 1.0
        xy = boxes[:, 0:2] + 0.5 * wh
        w, h = wh[:, 0:1], wh[:, 1:2]
        x, y = xy[:, 0:1], xy[:, 1:2]
        x1, y1, x2, y2 = boxes[:, 0:1], boxes[:, 1:2], boxes[:, 2:3], boxes[:, 3:4]
        infos.append(jnp.concatenate(
            [w / wid, h / hei, x / wid, y / hei,
             x1 / wid, y1 / hei, x2 / wid, y2 / hei,
             w * h / (wid * hei)], axis=-1))
    return jnp.concatenate(infos, axis=0)


def two_stream_context_forward(params, roi_features, boxes_list, img_sizes,
                               predict_logits_list, rel_pair_idxs,
                               union_prd, union_tpt, *, num_obj_cls):
    # TODO(synk): predict_logits only feeds softmax @ obj_embed1 -> lin_obj_textual ->
    # the textual stream of the (undefined) SHA_Encoder; dead under the identity
    # stand-in, so it is accepted for interface fidelity but unused.
    del predict_logits_list
    num_objs = [b.shape[0] for b in boxes_list]

    box_info = encode_box_info(boxes_list, img_sizes)            # [N, 9] f32
    roi_bf = roi_features.astype(jnp.bfloat16)                   # cast once

    # ---- single fused Pallas launch ---------------------------------------
    obj_dists_pad, edge_ctx_prd, head_proj, tail_proj, uni_part = fused_forward_call(
        params, box_info, roi_bf,
        union_prd.astype(jnp.bfloat16), union_tpt.astype(jnp.bfloat16))

    obj_dists = obj_dists_pad[:, :num_obj_cls]
    # sgcls + eval: argmax over non-background classes (no decoder NMS)
    obj_preds = jnp.argmax(obj_dists[:, 1:], axis=1) + 1

    # compose_rep: per-edge row gathers, commuted to AFTER the linear maps
    # (gather(x)[i] @ W == (x @ W)[i]); tiny jitted glue, neutral at these sizes.
    sbj_chunks, obj_chunks, off = [], [], 0
    for pairs, n in zip(rel_pair_idxs, num_objs):
        sbj_chunks.append(pairs[:, 0] + off)
        obj_chunks.append(pairs[:, 1] + off)
        off += n
    sbj_idx = jnp.concatenate(sbj_chunks, axis=0)
    obj_idx = jnp.concatenate(obj_chunks, axis=0)
    edge_ctx_tpt = (jnp.take(head_proj, sbj_idx, axis=0)
                    + jnp.take(tail_proj, obj_idx, axis=0)
                    + uni_part)

    return obj_dists, obj_preds, (edge_ctx_prd, edge_ctx_tpt)


# ----------------------------------------------------------------------------
# Main
# ----------------------------------------------------------------------------

if __name__ == "__main__":
    # Small synthetic 'sgcls' config (lane-friendly 128-multiple feature dims)
    NUM_OBJ_CLS = 10
    NUM_REL_CLS = 6          # part of the module config; unused in this forward
    IN_CHANNELS = 128
    HIDDEN_DIM = 128         # CONTEXT_HIDDEN_DIM
    COMPRESS_DIM = 128       # UNION_COMPRESS_DIM
    EMBED_DIM = 32           # GloVe dim; parameterizes only the elided textual streams
    OBJS_PER_IMG = 4
    EDGES_PER_IMG = 4
    NUM_IMGS = 2
    N = OBJS_PER_IMG * NUM_IMGS      # 8 objects total
    E = EDGES_PER_IMG * NUM_IMGS     # 8 relation edges total

    key = jax.random.PRNGKey(0)
    k_param, k_roi, k_log, k_box, k_up, k_ut, k_pair = jax.random.split(key, 7)

    params = make_params(k_param, NUM_OBJ_CLS, IN_CHANNELS, HIDDEN_DIM, COMPRESS_DIM)

    roi_features = jax.random.normal(k_roi, (N, IN_CHANNELS), jnp.float32)
    predict_logits_list = list(
        jax.random.normal(k_log, (NUM_IMGS, OBJS_PER_IMG, NUM_OBJ_CLS), jnp.float32))

    # xyxy boxes inside a 128x96 image
    xy1 = jax.random.uniform(k_box, (NUM_IMGS, OBJS_PER_IMG, 2), minval=0.0, maxval=60.0)
    wh = jax.random.uniform(jax.random.fold_in(k_box, 1), (NUM_IMGS, OBJS_PER_IMG, 2),
                            minval=8.0, maxval=30.0)
    boxes = jnp.concatenate([xy1, xy1 + wh], axis=-1)
    boxes_list = [boxes[i] for i in range(NUM_IMGS)]
    img_sizes = [(128.0, 96.0)] * NUM_IMGS

    rel_pair_idxs = [
        jax.random.randint(jax.random.fold_in(k_pair, i), (EDGES_PER_IMG, 2), 0, OBJS_PER_IMG)
        for i in range(NUM_IMGS)
    ]
    union_prd = jax.random.normal(k_up, (E, COMPRESS_DIM), jnp.float32)
    union_tpt = jax.random.normal(k_ut, (E, COMPRESS_DIM), jnp.float32)

    fwd = jax.jit(functools.partial(two_stream_context_forward, num_obj_cls=NUM_OBJ_CLS))
    obj_dists, obj_preds, (edge_ctx_prd, edge_ctx_tpt) = fwd(
        params, roi_features, boxes_list, img_sizes, predict_logits_list,
        rel_pair_idxs, union_prd, union_tpt)
    jax.block_until_ready((obj_dists, obj_preds, edge_ctx_prd, edge_ctx_tpt))

    assert obj_dists.shape == (N, NUM_OBJ_CLS)
    assert obj_preds.shape == (N,)
    assert edge_ctx_prd.shape == (E, HIDDEN_DIM)
    assert edge_ctx_tpt.shape == (E, HIDDEN_DIM)
    assert bool(jnp.all(jnp.isfinite(obj_dists)))
    assert bool(jnp.all(jnp.isfinite(edge_ctx_prd)))
    assert bool(jnp.all(jnp.isfinite(edge_ctx_tpt)))
    print("KERNEL_OK")
</pallas_src>

<mosaic_0001>
module attributes {stable_mosaic.version = 11 : i64} {
  func.func @_fused_forward_kernel(%arg0: i32, %arg1: memref<8x9xf32, #tpu.memory_space<vmem>>, %arg2: memref<8x128xbf16, #tpu.memory_space<vmem>>, %arg3: memref<8x128xbf16, #tpu.memory_space<vmem>>, %arg4: memref<8x128xbf16, #tpu.memory_space<vmem>>, %arg5: memref<9x32xbf16, #tpu.memory_space<vmem>>, %arg6: memref<1x32xf32, #tpu.memory_space<vmem>>, %arg7: memref<32x128xbf16, #tpu.memory_space<vmem>>, %arg8: memref<1x128xf32, #tpu.memory_space<vmem>>, %arg9: memref<128x128xbf16, #tpu.memory_space<vmem>>, %arg10: memref<128x128xbf16, #tpu.memory_space<vmem>>, %arg11: memref<1x128xf32, #tpu.memory_space<vmem>>, %arg12: memref<128x128xbf16, #tpu.memory_space<vmem>>, %arg13: memref<1x128xf32, #tpu.memory_space<vmem>>, %arg14: memref<128x256xbf16, #tpu.memory_space<vmem>>, %arg15: memref<128x256xbf16, #tpu.memory_space<vmem>>, %arg16: memref<1x256xf32, #tpu.memory_space<vmem>>, %arg17: memref<128x128xbf16, #tpu.memory_space<vmem>>, %arg18: memref<128x128xbf16, #tpu.memory_space<vmem>>, %arg19: memref<128x128xbf16, #tpu.memory_space<vmem>>, %arg20: memref<1x128xf32, #tpu.memory_space<vmem>>, %arg21: memref<128x128xbf16, #tpu.memory_space<vmem>>, %arg22: memref<1x128xf32, #tpu.memory_space<vmem>>, %arg23: memref<8x128xf32, #tpu.memory_space<vmem>>, %arg24: memref<8x128xf32, #tpu.memory_space<vmem>>, %arg25: memref<8x128xf32, #tpu.memory_space<vmem>>, %arg26: memref<8x128xf32, #tpu.memory_space<vmem>>, %arg27: memref<8x128xf32, #tpu.memory_space<vmem>>) attributes {dimension_semantics = [#tpu.dimension_semantics<arbitrary>], iteration_bounds = array<i64: 1>, scalar_prefetch = 0 : i64, scratch_operands = 0 : i64, tpu.core_type = #tpu.core_type<tc>, window_params = [{pipeline_mode = #tpu.pipeline_mode<synchronous>, transform_indices = @transform_0, window_bounds = array<i64: 8, 9>}, {pipeline_mode = #tpu.pipeline_mode<synchronous>, transform_indices = @transform_1, window_bounds = array<i64: 8, 128>}, {pipeline_mode = #tpu.pipeline_mode<synchronous>, transform_indices = @transform_2, window_bounds = array<i64: 8, 128>}, {pipeline_mode = #tpu.pipeline_mode<synchronous>, transform_indices = @transform_3, window_bounds = array<i64: 8, 128>}, {pipeline_mode = #tpu.pipeline_mode<synchronous>, transform_indices = @transform_4, window_bounds = array<i64: 9, 32>}, {pipeline_mode = #tpu.pipeline_mode<synchronous>, transform_indices = @transform_5, window_bounds = array<i64: 1, 32>}, {pipeline_mode = #tpu.pipeline_mode<synchronous>, transform_indices = @transform_6, window_bounds = array<i64: 32, 128>}, {pipeline_mode = #tpu.pipeline_mode<synchronous>, transform_indices = @transform_7, window_bounds = array<i64: 1, 128>}, {pipeline_mode = #tpu.pipeline_mode<synchronous>, transform_indices = @transform_8, window_bounds = array<i64: 128, 128>}, {pipeline_mode = #tpu.pipeline_mode<synchronous>, transform_indices = @transform_9, window_bounds = array<i64: 128, 128>}, {pipeline_mode = #tpu.pipeline_mode<synchronous>, transform_indices = @transform_10, window_bounds = array<i64: 1, 128>}, {pipeline_mode = #tpu.pipeline_mode<synchronous>, transform_indices = @transform_11, window_bounds = array<i64: 128, 128>}, {pipeline_mode = #tpu.pipeline_mode<synchronous>, transform_indices = @transform_12, window_bounds = array<i64: 1, 128>}, {pipeline_mode = #tpu.pipeline_mode<synchronous>, transform_indices = @transform_13, window_bounds = array<i64: 128, 256>}, {pipeline_mode = #tpu.pipeline_mode<synchronous>, transform_indices = @transform_14, window_bounds = array<i64: 128, 256>}, {pipeline_mode = #tpu.pipeline_mode<synchronous>, transform_indices = @transform_15, window_bounds = array<i64: 1, 256>}, {pipeline_mode = #tpu.pipeline_mode<synchronous>, transform_indices = @transform_16, window_bounds = array<i64: 128, 128>}, {pipeline_mode = #tpu.pipeline_mode<synchronous>, transform_indices = @transform_17, window_bounds = array<i64: 128, 128>}, {pipeline_mode = #tpu.pipeline_mode<synchronous>, transform_indices = @transform_18, window_bounds = array<i64: 128, 128>}, {pipeline_mode = #tpu.pipeline_mode<synchronous>, transform_indices = @transform_19, window_bounds = array<i64: 1, 128>}, {pipeline_mode = #tpu.pipeline_mode<synchronous>, transform_indices = @transform_20, window_bounds = array<i64: 128, 128>}, {pipeline_mode = #tpu.pipeline_mode<synchronous>, transform_indices = @transform_21, window_bounds = array<i64: 1, 128>}, {pipeline_mode = #tpu.pipeline_mode<synchronous>, transform_indices = @transform_22, window_bounds = array<i64: 8, 128>}, {pipeline_mode = #tpu.pipeline_mode<synchronous>, transform_indices = @transform_23, window_bounds = array<i64: 8, 128>}, {pipeline_mode = #tpu.pipeline_mode<synchronous>, transform_indices = @transform_24, window_bounds = array<i64: 8, 128>}, {pipeline_mode = #tpu.pipeline_mode<synchronous>, transform_indices = @transform_25, window_bounds = array<i64: 8, 128>}, {pipeline_mode = #tpu.pipeline_mode<synchronous>, transform_indices = @transform_26, window_bounds = array<i64: 8, 128>}]} {
    %c0 = arith.constant 0 : index
    %c0_0 = arith.constant 0 : index
    %0 = vector.load %arg1[%c0, %c0_0] : memref<8x9xf32, #tpu.memory_space<vmem>>, vector<8x9xf32>
    %1 = arith.truncf %0 : vector<8x9xf32> to vector<8x9xbf16>
    %c0_1 = arith.constant 0 : index
    %c0_2 = arith.constant 0 : index
    %2 = vector.load %arg5[%c0_1, %c0_2] : memref<9x32xbf16, #tpu.memory_space<vmem>>, vector<9x32xbf16>
    %cst = arith.constant dense<0.000000e+00> : vector<8x32xf32>
    %3 = tpu.matmul %1, %2, %cst {dimension_numbers = #tpu.dot_dimension_numbers<[1], [0], [0], [1], [0, 0, 1, 1], [], []>} : vector<8x9xbf16>, vector<9x32xbf16>, vector<8x32xf32> -> vector<8x32xf32>
    %c0_3 = arith.constant 0 : index
    %c0_4 = arith.constant 0 : index
    %4 = vector.load %arg6[%c0_3, %c0_4] : memref<1x32xf32, #tpu.memory_space<vmem>>, vector<1x32xf32>
    %5 = vector.broadcast %4 : vector<1x32xf32> to vector<8x32xf32>
    %6 = arith.addf %3, %5 : vector<8x32xf32>
    %cst_5 = arith.constant 0.000000e+00 : f32
    %7 = vector.broadcast %cst_5 : f32 to vector<8x32xf32>
    %8 = arith.maximumf %6, %7 : vector<8x32xf32>
    %9 = arith.truncf %8 : vector<8x32xf32> to vector<8x32xbf16>
    %c0_6 = arith.constant 0 : index
    %c0_7 = arith.constant 0 : index
    %10 = vector.load %arg7[%c0_6, %c0_7] : memref<32x128xbf16, #tpu.memory_space<vmem>>, vector<32x128xbf16>
    %cst_8 = arith.constant dense<0.000000e+00> : vector<8x128xf32>
    %11 = tpu.matmul %9, %10, %cst_8 {dimension_numbers = #tpu.dot_dimension_numbers<[1], [0], [0], [1], [0, 0, 1, 1], [], []>} : vector<8x32xbf16>, vector<32x128xbf16>, vector<8x128xf32> -> vector<8x128xf32>
    %c0_9 = arith.constant 0 : index
    %c0_10 = arith.constant 0 : index
    %12 = vector.load %arg8[%c0_9, %c0_10] : memref<1x128xf32, #tpu.memory_space<vmem>>, vector<1x128xf32>
    %13 = vector.broadcast %12 : vector<1x128xf32> to vector<8x128xf32>
    %14 = arith.addf %11, %13 : vector<8x128xf32>
    %cst_11 = arith.constant 0.000000e+00 : f32
    %15 = vector.broadcast %cst_11 : f32 to vector<8x128xf32>
    %16 = arith.maximumf %14, %15 : vector<8x128xf32>
    %c0_12 = arith.constant 0 : index
    %c0_13 = arith.constant 0 : index
    %17 = vector.load %arg2[%c0_12, %c0_13] : memref<8x128xbf16, #tpu.memory_space<vmem>>, vector<8x128xbf16>
    %c0_14 = arith.constant 0 : index
    %c0_15 = arith.constant 0 : index
    %18 = vector.load %arg9[%c0_14, %c0_15] : memref<128x128xbf16, #tpu.memory_space<vmem>>, vector<128x128xbf16>
    %cst_16 = arith.constant dense<0.000000e+00> : vector<8x128xf32>
    %19 = tpu.matmul %17, %18, %cst_16 {dimension_numbers = #tpu.dot_dimension_numbers<[1], [0], [0], [1], [0, 0, 1, 1], [], []>} : vector<8x128xbf16>, vector<128x128xbf16>, vector<8x128xf32> -> vector<8x128xf32>
    %20 = arith.truncf %16 : vector<8x128xf32> to vector<8x128xbf16>
    %c0_17 = arith.constant 0 : index
    %c0_18 = arith.constant 0 : index
    %21 = vector.load %arg10[%c0_17, %c0_18] : memref<128x128xbf16, #tpu.memory_space<vmem>>, vector<128x128xbf16>
    %cst_19 = arith.constant dense<0.000000e+00> : vector<8x128xf32>
    %22 = tpu.matmul %20, %21, %cst_19 {dimension_numbers = #tpu.dot_dimension_numbers<[1], [0], [0], [1], [0, 0, 1, 1], [], []>} : vector<8x128xbf16>, vector<128x128xbf16>, vector<8x128xf32> -> vector<8x128xf32>
    %23 = arith.addf %19, %22 : vector<8x128xf32>
    %c0_20 = arith.constant 0 : index
    %c0_21 = arith.constant 0 : index
    %24 = vector.load %arg11[%c0_20, %c0_21] : memref<1x128xf32, #tpu.memory_space<vmem>>, vector<1x128xf32>
    %25 = vector.broadcast %24 : vector<1x128xf32> to vector<8x128xf32>
    %26 = arith.addf %23, %25 : vector<8x128xf32>
    %27 = arith.truncf %26 : vector<8x128xf32> to vector<8x128xbf16>
    %c0_22 = arith.constant 0 : index
    %c0_23 = arith.constant 0 : index
    %28 = vector.load %arg12[%c0_22, %c0_23] : memref<128x128xbf16, #tpu.memory_space<vmem>>, vector<128x128xbf16>
    %cst_24 = arith.constant dense<0.000000e+00> : vector<8x128xf32>
    %29 = tpu.matmul %27, %28, %cst_24 {dimension_numbers = #tpu.dot_dimension_numbers<[1], [0], [0], [1], [0, 0, 1, 1], [], []>} : vector<8x128xbf16>, vector<128x128xbf16>, vector<8x128xf32> -> vector<8x128xf32>
    %c0_25 = arith.constant 0 : index
    %c0_26 = arith.constant 0 : index
    %30 = vector.load %arg13[%c0_25, %c0_26] : memref<1x128xf32, #tpu.memory_space<vmem>>, vector<1x128xf32>
    %31 = vector.broadcast %30 : vector<1x128xf32> to vector<8x128xf32>
    %32 = arith.addf %29, %31 : vector<8x128xf32>
    %c0_27 = arith.constant 0 : index
    %c0_28 = arith.constant 0 : index
    %33 = vector.load %arg23[%c0_27, %c0_28] : memref<8x128xf32, #tpu.memory_space<vmem>>, vector<8x128xf32>
    tpu.vector_store %arg23[%c0_27, %c0_28], %32 {strides = array<i32>} : memref<8x128xf32, #tpu.memory_space<vmem>>, vector<8x128xf32>,
    %c0_29 = arith.constant 0 : index
    %c0_30 = arith.constant 0 : index
    %34 = vector.load %arg14[%c0_29, %c0_30] : memref<128x256xbf16, #tpu.memory_space<vmem>>, vector<128x256xbf16>
    %cst_31 = arith.constant dense<0.000000e+00> : vector<8x256xf32>
    %35 = tpu.matmul %17, %34, %cst_31 {dimension_numbers = #tpu.dot_dimension_numbers<[1], [0], [0], [1], [0, 0, 1, 1], [], []>} : vector<8x128xbf16>, vector<128x256xbf16>, vector<8x256xf32> -> vector<8x256xf32>
    %c0_32 = arith.constant 0 : index
    %c0_33 = arith.constant 0 : index
    %36 = vector.load %arg15[%c0_32, %c0_33] : memref<128x256xbf16, #tpu.memory_space<vmem>>, vector<128x256xbf16>
    %cst_34 = arith.constant dense<0.000000e+00> : vector<8x256xf32>
    %37 = tpu.matmul %27, %36, %cst_34 {dimension_numbers = #tpu.dot_dimension_numbers<[1], [0], [0], [1], [0, 0, 1, 1], [], []>} : vector<8x128xbf16>, vector<128x256xbf16>, vector<8x256xf32> -> vector<8x256xf32>
    %38 = arith.addf %35, %37 : vector<8x256xf32>
    %c0_35 = arith.constant 0 : index
    %c0_36 = arith.constant 0 : index
    %39 = vector.load %arg16[%c0_35, %c0_36] : memref<1x256xf32, #tpu.memory_space<vmem>>, vector<1x256xf32>
    %40 = vector.broadcast %39 : vector<1x256xf32> to vector<8x256xf32>
    %41 = arith.addf %38, %40 : vector<8x256xf32>
    %42 = vector.extract_strided_slice %41 {offsets = [0, 0], sizes = [8, 128], strides = [1, 1]} : vector<8x256xf32> to vector<8x128xf32>
    %43 = arith.truncf %42 : vector<8x128xf32> to vector<8x128xbf16>
    %44 = vector.extract_strided_slice %41 {offsets = [0, 128], sizes = [8, 128], strides = [1, 1]} : vector<8x256xf32> to vector<8x128xf32>
    %45 = arith.truncf %44 : vector<8x128xf32> to vector<8x128xbf16>
    %c0_37 = arith.constant 0 : index
    %c0_38 = arith.constant 0 : index
    %46 = vector.load %arg17[%c0_37, %c0_38] : memref<128x128xbf16, #tpu.memory_space<vmem>>, vector<128x128xbf16>
    %cst_39 = arith.constant dense<0.000000e+00> : vector<8x128xf32>
    %47 = tpu.matmul %43, %46, %cst_39 {dimension_numbers = #tpu.dot_dimension_numbers<[1], [0], [0], [1], [0, 0, 1, 1], [], []>} : vector<8x128xbf16>, vector<128x128xbf16>, vector<8x128xf32> -> vector<8x128xf32>
    %c0_40 = arith.constant 0 : index
    %c0_41 = arith.constant 0 : index
    %48 = vector.load %arg25[%c0_40, %c0_41] : memref<8x128xf32, #tpu.memory_space<vmem>>, vector<8x128xf32>
    tpu.vector_store %arg25[%c0_40, %c0_41], %47 {strides = array<i32>} : memref<8x128xf32, #tpu.memory_space<vmem>>, vector<8x128xf32>,
    %c0_42 = arith.constant 0 : index
    %c0_43 = arith.constant 0 : index
    %49 = vector.load %arg18[%c0_42, %c0_43] : memref<128x128xbf16, #tpu.memory_space<vmem>>, vector<128x128xbf16>
    %cst_44 = arith.constant dense<0.000000e+00> : vector<8x128xf32>
    %50 = tpu.matmul %45, %49, %cst_44 {dimension_numbers = #tpu.dot_dimension_numbers<[1], [0], [0], [1], [0, 0, 1, 1], [], []>} : vector<8x128xbf16>, vector<128x128xbf16>, vector<8x128xf32> -> vector<8x128xf32>
    %c0_45 = arith.constant 0 : index
    %c0_46 = arith.constant 0 : index
    %51 = vector.load %arg26[%c0_45, %c0_46] : memref<8x128xf32, #tpu.memory_space<vmem>>, vector<8x128xf32>
    tpu.vector_store %arg26[%c0_45, %c0_46], %50 {strides = array<i32>} : memref<8x128xf32, #tpu.memory_space<vmem>>, vector<8x128xf32>,
    %c0_47 = arith.constant 0 : index
    %c0_48 = arith.constant 0 : index
    %52 = vector.load %arg4[%c0_47, %c0_48] : memref<8x128xbf16, #tpu.memory_space<vmem>>, vector<8x128xbf16>
    %c0_49 = arith.constant 0 : index
    %c0_50 = arith.constant 0 : index
    %53 = vector.load %arg19[%c0_49, %c0_50] : memref<128x128xbf16, #tpu.memory_space<vmem>>, vector<128x128xbf16>
    %cst_51 = arith.constant dense<0.000000e+00> : vector<8x128xf32>
    %54 = tpu.matmul %52, %53, %cst_51 {dimension_numbers = #tpu.dot_dimension_numbers<[1], [0], [0], [1], [0, 0, 1, 1], [], []>} : vector<8x128xbf16>, vector<128x128xbf16>, vector<8x128xf32> -> vector<8x128xf32>
    %c0_52 = arith.constant 0 : index
    %c0_53 = arith.constant 0 : index
    %55 = vector.load %arg20[%c0_52, %c0_53] : memref<1x128xf32, #tpu.memory_space<vmem>>, vector<1x128xf32>
    %56 = vector.broadcast %55 : vector<1x128xf32> to vector<8x128xf32>
    %57 = arith.addf %54, %56 : vector<8x128xf32>
    %c0_54 = arith.constant 0 : index
    %c0_55 = arith.constant 0 : index
    %58 = vector.load %arg27[%c0_54, %c0_55] : memref<8x128xf32, #tpu.memory_space<vmem>>, vector<8x128xf32>
    tpu.vector_store %arg27[%c0_54, %c0_55], %57 {strides = array<i32>} : memref<8x128xf32, #tpu.memory_space<vmem>>, vector<8x128xf32>,
    %c0_56 = arith.constant 0 : index
    %c0_57 = arith.constant 0 : index
    %59 = vector.load %arg3[%c0_56, %c0_57] : memref<8x128xbf16, #tpu.memory_space<vmem>>, vector<8x128xbf16>
    %c0_58 = arith.constant 0 : index
    %c0_59 = arith.constant 0 : index
    %60 = vector.load %arg21[%c0_58, %c0_59] : memref<128x128xbf16, #tpu.memory_space<vmem>>, vector<128x128xbf16>
    %cst_60 = arith.constant dense<0.000000e+00> : vector<8x128xf32>
    %61 = tpu.matmul %59, %60, %cst_60 {dimension_numbers = #tpu.dot_dimension_numbers<[1], [0], [0], [1], [0, 0, 1, 1], [], []>} : vector<8x128xbf16>, vector<128x128xbf16>, vector<8x128xf32> -> vector<8x128xf32>
    %c0_61 = arith.constant 0 : index
    %c0_62 = arith.constant 0 : index
    %62 = vector.load %arg22[%c0_61, %c0_62] : memref<1x128xf32, #tpu.memory_space<vmem>>, vector<1x128xf32>
    %63 = vector.broadcast %62 : vector<1x128xf32> to vector<8x128xf32>
    %64 = arith.addf %61, %63 : vector<8x128xf32>
    %c0_63 = arith.constant 0 : index
    %c0_64 = arith.constant 0 : index
    %65 = vector.load %arg24[%c0_63, %c0_64] : memref<8x128xf32, #tpu.memory_space<vmem>>, vector<8x128xf32>
    tpu.vector_store %arg24[%c0_63, %c0_64], %64 {strides = array<i32>} : memref<8x128xf32, #tpu.memory_space<vmem>>, vector<8x128xf32>,
    return
  }
  func.func @transform_0(%arg0: i32) -> (i32, i32) {
    %c0_i32 = arith.constant 0 : i32
    %c0_i32_0 = arith.constant 0 : i32
    %c0_i32_1 = arith.constant 0 : i32
    return %c0_i32, %c0_i32_0 : i32, i32
  }
  func.func @transform_1(%arg0: i32) -> (i32, i32) {
    %c0_i32 = arith.constant 0 : i32
    %c0_i32_0 = arith.constant 0 : i32
    %c0_i32_1 = arith.constant 0 : i32
    return %c0_i32, %c0_i32_0 : i32, i32
  }
  func.func @transform_2(%arg0: i32) -> (i32, i32) {
    %c0_i32 = arith.constant 0 : i32
    %c0_i32_0 = arith.constant 0 : i32
    %c0_i32_1 = arith.constant 0 : i32
    return %c0_i32, %c0_i32_0 : i32, i32
  }
  func.func @transform_3(%arg0: i32) -> (i32, i32) {
    %c0_i32 = arith.constant 0 : i32
    %c0_i32_0 = arith.constant 0 : i32
    %c0_i32_1 = arith.constant 0 : i32
    return %c0_i32, %c0_i32_0 : i32, i32
  }
  func.func @transform_4(%arg0: i32) -> (i32, i32) {
    %c0_i32 = arith.constant 0 : i32
    %c0_i32_0 = arith.constant 0 : i32
    %c0_i32_1 = arith.constant 0 : i32
    return %c0_i32, %c0_i32_0 : i32, i32
  }
  func.func @transform_5(%arg0: i32) -> (i32, i32) {
    %c0_i32 = arith.constant 0 : i32
    %c0_i32_0 = arith.constant 0 : i32
    %c0_i32_1 = arith.constant 0 : i32
    return %c0_i32, %c0_i32_0 : i32, i32
  }
  func.func @transform_6(%arg0: i32) -> (i32, i32) {
    %c0_i32 = arith.constant 0 : i32
    %c0_i32_0 = arith.constant 0 : i32
    %c0_i32_1 = arith.constant 0 : i32
    return %c0_i32, %c0_i32_0 : i32, i32
  }
  func.func @transform_7(%arg0: i32) -> (i32, i32) {
    %c0_i32 = arith.constant 0 : i32
    %c0_i32_0 = arith.constant 0 : i32
    %c0_i32_1 = arith.constant 0 : i32
    return %c0_i32, %c0_i32_0 : i32, i32
  }
  func.func @transform_8(%arg0: i32) -> (i32, i32) {
    %c0_i32 = arith.constant 0 : i32
    %c0_i32_0 = arith.constant 0 : i32
    %c0_i32_1 = arith.constant 0 : i32
    return %c0_i32, %c0_i32_0 : i32, i32
  }
  func.func @transform_9(%arg0: i32) -> (i32, i32) {
    %c0_i32 = arith.constant 0 : i32
    %c0_i32_0 = arith.constant 0 : i32
    %c0_i32_1 = arith.constant 0 : i32
    return %c0_i32, %c0_i32_0 : i32, i32
  }
  func.func @transform_10(%arg0: i32) -> (i32, i32) {
    %c0_i32 = arith.constant 0 : i32
    %c0_i32_0 = arith.constant 0 : i32
    %c0_i32_1 = arith.constant 0 : i32
    return %c0_i32, %c0_i32_0 : i32, i32
  }
  func.func @transform_11(%arg0: i32) -> (i32, i32) {
    %c0_i32 = arith.constant 0 : i32
    %c0_i32_0 = arith.constant 0 : i32
    %c0_i32_1 = arith.constant 0 : i32
    return %c0_i32, %c0_i32_0 : i32, i32
  }
  func.func @transform_12(%arg0: i32) -> (i32, i32) {
    %c0_i32 = arith.constant 0 : i32
    %c0_i32_0 = arith.constant 0 : i32
    %c0_i32_1 = arith.constant 0 : i32
    return %c0_i32, %c0_i32_0 : i32, i32
  }
  func.func @transform_13(%arg0: i32) -> (i32, i32) {
    %c0_i32 = arith.constant 0 : i32
    %c0_i32_0 = arith.constant 0 : i32
    %c0_i32_1 = arith.constant 0 : i32
    return %c0_i32, %c0_i32_0 : i32, i32
  }
  func.func @transform_14(%arg0: i32) -> (i32, i32) {
    %c0_i32 = arith.constant 0 : i32
    %c0_i32_0 = arith.constant 0 : i32
    %c0_i32_1 = arith.constant 0 : i32
    return %c0_i32, %c0_i32_0 : i32, i32
  }
  func.func @transform_15(%arg0: i32) -> (i32, i32) {
    %c0_i32 = arith.constant 0 : i32
    %c0_i32_0 = arith.constant 0 : i32
    %c0_i32_1 = arith.constant 0 : i32
    return %c0_i32, %c0_i32_0 : i32, i32
  }
  func.func @transform_16(%arg0: i32) -> (i32, i32) {
    %c0_i32 = arith.constant 0 : i32
    %c0_i32_0 = arith.constant 0 : i32
    %c0_i32_1 = arith.constant 0 : i32
    return %c0_i32, %c0_i32_0 : i32, i32
  }
  func.func @transform_17(%arg0: i32) -> (i32, i32) {
    %c0_i32 = arith.constant 0 : i32
    %c0_i32_0 = arith.constant 0 : i32
    %c0_i32_1 = arith.constant 0 : i32
    return %c0_i32, %c0_i32_0 : i32, i32
  }
  func.func @transform_18(%arg0: i32) -> (i32, i32) {
    %c0_i32 = arith.constant 0 : i32
    %c0_i32_0 = arith.constant 0 : i32
    %c0_i32_1 = arith.constant 0 : i32
    return %c0_i32, %c0_i32_0 : i32, i32
  }
  func.func @transform_19(%arg0: i32) -> (i32, i32) {
    %c0_i32 = arith.constant 0 : i32
    %c0_i32_0 = arith.constant 0 : i32
    %c0_i32_1 = arith.constant 0 : i32
    return %c0_i32, %c0_i32_0 : i32, i32
  }
  func.func @transform_20(%arg0: i32) -> (i32, i32) {
    %c0_i32 = arith.constant 0 : i32
    %c0_i32_0 = arith.constant 0 : i32
    %c0_i32_1 = arith.constant 0 : i32
    return %c0_i32, %c0_i32_0 : i32, i32
  }
  func.func @transform_21(%arg0: i32) -> (i32, i32) {
    %c0_i32 = arith.constant 0 : i32
    %c0_i32_0 = arith.constant 0 : i32
    %c0_i32_1 = arith.constant 0 : i32
    return %c0_i32, %c0_i32_0 : i32, i32
  }
  func.func @transform_22(%arg0: i32) -> (i32, i32) {
    %c0_i32 = arith.constant 0 : i32
    %c0_i32_0 = arith.constant 0 : i32
    %c0_i32_1 = arith.constant 0 : i32
    return %c0_i32, %c0_i32_0 : i32, i32
  }
  func.func @transform_23(%arg0: i32) -> (i32, i32) {
    %c0_i32 = arith.constant 0 : i32
    %c0_i32_0 = arith.constant 0 : i32
    %c0_i32_1 = arith.constant 0 : i32
    return %c0_i32, %c0_i32_0 : i32, i32
  }
  func.func @transform_24(%arg0: i32) -> (i32, i32) {
    %c0_i32 = arith.constant 0 : i32
    %c0_i32_0 = arith.constant 0 : i32
    %c0_i32_1 = arith.constant 0 : i32
    return %c0_i32, %c0_i32_0 : i32, i32
  }
  func.func @transform_25(%arg0: i32) -> (i32, i32) {
    %c0_i32 = arith.constant 0 : i32
    %c0_i32_0 = arith.constant 0 : i32
    %c0_i32_1 = arith.constant 0 : i32
    return %c0_i32, %c0_i32_0 : i32, i32
  }
  func.func @transform_26(%arg0: i32) -> (i32, i32) {
    %c0_i32 = arith.constant 0 : i32
    %c0_i32_0 = arith.constant 0 : i32
    %c0_i32_1 = arith.constant 0 : i32
    return %c0_i32, %c0_i32_0 : i32, i32
  }
}

</mosaic_0001>

<bundles_post_ra>
// kernel: two_stream_context_forward.1
= control target key start
LH: loop header
LB: loop body
LE: loop exit
PB: predicated region body
PF: predicated region fallthrough
CT: control target
= control target key end

     0   :  { %s2241_s0 = inlined_call_operand.vmem [shape: f32[8,9], index: 0, kind: input, shape index: {}]   ;;  %s2242_s1 = inlined_call_operand.vmem [shape: bf16[8,128], index: 1, kind: input, shape index: {}]   ;;  %s2243_s2 = inlined_call_operand.vmem [shape: bf16[8,128], index: 2, kind: input, shape index: {}]   ;;  %s2244_s3 = inlined_call_operand.vmem [shape: bf16[8,128], index: 3, kind: input, shape index: {}]   ;;  %s2245_s4 = inlined_call_operand.vmem [shape: bf16[9,32], index: 4, kind: input, shape index: {}]   ;;  %s2246_s5 = inlined_call_operand.vmem [shape: f32[1,32], index: 5, kind: input, shape index: {}]   ;;  %s2247_s6 = inlined_call_operand.vmem [shape: bf16[32,128], index: 6, kind: input, shape index: {}]   ;;  %s2248_s7 = inlined_call_operand.vmem [shape: f32[1,128], index: 7, kind: input, shape index: {}]   ;;  %s2249_s8 = inlined_call_operand.hbm [shape: bf16[128,128], index: 8, kind: input, shape index: {}]   ;;  %s2250_s9 = inlined_call_operand.hbm [shape: bf16[128,128], index: 9, kind: input, shape index: {}]   ;;  %s2251_s10 = inlined_call_operand.vmem [shape: f32[1,128], index: 10, kind: input, shape index: {}]   ;;  %s2252_s11 = inlined_call_operand.hbm [shape: bf16[128,128], index: 11, kind: input, shape index: {}]   ;;  %s2253_s12 = inlined_call_operand.vmem [shape: f32[1,128], index: 12, kind: input, shape index: {}]   ;;  %s2254_s13 = inlined_call_operand.vmem [shape: bf16[128,256], index: 13, kind: input, shape index: {}]   ;;  %s2255_s14 = inlined_call_operand.vmem [shape: bf16[128,256], index: 14, kind: input, shape index: {}]   ;;  %s2256_s15 = inlined_call_operand.vmem [shape: f32[1,256], index: 15, kind: input, shape index: {}]   ;;  %s2257_s16 = inlined_call_operand.hbm [shape: bf16[128,128], index: 16, kind: input, shape index: {}]   ;;  %s2258_s17 = inlined_call_operand.hbm [shape: bf16[128,128], index: 17, kind: input, shape index: {}]   ;;  %s2259_s18 = inlined_call_operand.hbm [shape: bf16[128,128], index: 18, kind: input, shape index: {}]   ;;  %s2260_s19 = inlined_call_operand.vmem [shape: f32[1,128], index: 19, kind: input, shape index: {}]   ;;  %s2261_s20 = inlined_call_operand.hbm [shape: bf16[128,128], index: 20, kind: input, shape index: {}]   ;;  %s2262_s21 = inlined_call_operand.vmem [shape: f32[1,128], index: 21, kind: input, shape index: {}]   ;;  %s2263_s22 = inlined_call_operand.vmem [shape: f32[8,128], index: 22, kind: output, shape index: {0}]   ;;  %s2264_s23 = inlined_call_operand.hbm [shape: f32[8,128], index: 23, kind: output, shape index: {1}]   ;;  %s2265_s24 = inlined_call_operand.vmem [shape: f32[8,128], index: 24, kind: output, shape index: {2}]   ;;  %s2266_s25 = inlined_call_operand.vmem [shape: f32[8,128], index: 25, kind: output, shape index: {3}]   ;;  %s2267_s26 = inlined_call_operand.vmem [shape: f32[8,128], index: 26, kind: output, shape index: {4}]  }
   0x1   :  { %2270 = sst [smem:[#allocation20_spill]] %s2241_s0 }
   0x2   :  { %2271 = sst [smem:[#allocation21_spill]] %s2242_s1 }
   0x3   :  { %2272 = sst [smem:[#allocation22_spill]] %s2243_s2 }
   0x4   :  { %2273 = sst [smem:[#allocation23_spill]] %s2244_s3 }
   0x5   :  { %2274 = sst [smem:[#allocation24_spill]] %s2245_s4 }
   0x6   :  { %2275 = sst [smem:[#allocation25_spill]] %s2246_s5 }
   0x7   :  { %2276 = sst [smem:[#allocation26_spill]] %s2247_s6 }
   0x8   :  { %2277 = sst [smem:[#allocation27_spill]] %s2248_s7 }
   0x9   :  { %2278 = sst [smem:[#allocation28_spill]] %s2249_s8 }
   0xa   :  { %2279 = sst [smem:[#allocation29_spill]] %s2250_s9 }
   0xb   :  { %2280 = sst [smem:[#allocation30_spill]] %s2251_s10 }
   0xc   :  { %32 = vsyncpa [#allocation3], 0 }
   0xd   :  { %33 = vsyncpa [#allocation6], 0 }
   0xe   :  { %34 = vsyncpa [#allocation9], 0 }
   0xf   :  { %35 = vsyncpa [#allocation12], 0 }
  0x10   :  { %36 = vsyncpa [#allocation4], 0  ;;  %s2281_s7 = sld [smem:[#allocation29_spill]]  ;;  %s1796_s8 = smov [#allocation5]  }
  0x11   :  { %s72_s4 = sshll.u32 %s1796_s8, 4  ;;  %s106_s9 = sshll.u32 %s2257_s16, 4  ;;  %s73_s4 = int_to_ptr.vmem [resolvable:$true] %s72_s4  ;;  %s107_s9 = int_to_ptr.hbm [resolvable:$true] %s106_s9 }
  0x12   :  { %s1797_s30 = smov 64   ;;  %s1798_s2 = smov 4  }
  0x13   :  { %s1799_s5 = smov [#allocation8]   ;;  %s132_s27 = sshll.u32 %s2259_s18, 4  ;;  %s133_s27 = int_to_ptr.hbm [resolvable:$true] %s132_s27 }
  0x14   :  { %s108_s10 = sshll.u32 %s1799_s5, 4  ;;  %s1800_s29 = smov [#allocation11]   ;;  %s109_s10 = int_to_ptr.vmem [resolvable:$true] %s108_s10 }
  0x15   :  { %114 = dma.hbm_to_vmem [thread:$0]  %s107_s9, 1024, %s109_s10, [#allocation9], %s1797_s30, %s1797_s30, %s1798_s2  }
  0x16   :  { %s70_s28 = sshll.u32 %s2281_s7, 4  ;;  %s2282_s7 = sld [smem:[#allocation28_spill]]  ;;  %s71_s28 = int_to_ptr.hbm [resolvable:$true] %s70_s28 }
  0x17   :  { %78 = dma.hbm_to_vmem [thread:$0]  %s71_s28, 1024, %s73_s4, [#allocation6], %s1797_s30, %s1797_s30, %s1798_s2  }
  0x18   :  { %s134_s0 = sshll.u32 %s1800_s29, 4  ;;  %s1801_s28 = smov [#allocation2]   ;;  %s135_s0 = int_to_ptr.vmem [resolvable:$true] %s134_s0 }
  0x19   :  { %140 = dma.hbm_to_vmem [thread:$0]  %s133_s27, 1024, %s135_s0, [#allocation12], %s1797_s30, %s1797_s30, %s1798_s2  }
  0x1a   :  { %s59_s18 = sshll.u32 %s1801_s28, 4  ;;  %s85_s6 = sshll.u32 %s2252_s11, 4  ;;  %s60_s18 = int_to_ptr.vmem [resolvable:$true] %s59_s18  ;;  %s86_s6 = int_to_ptr.hbm [resolvable:$true] %s85_s6 }
  0x1b   :  { %s119_s1 = sshll.u32 %s2258_s17, 4  ;;  %s1802_s16 = smov [#allocation7]   ;;  %s120_s1 = int_to_ptr.hbm [resolvable:$true] %s119_s1 }
  0x1c   :  { %s57_s8 = sshll.u32 %s2282_s7, 4  ;;  %s87_s3 = sshll.u32 %s1802_s16, 4  ;;  %s58_s8 = int_to_ptr.hbm [resolvable:$true] %s57_s8  ;;  %s88_s3 = int_to_ptr.vmem [resolvable:$true] %s87_s3 }
  0x1d   :  { %65 = dma.hbm_to_vmem [thread:$0]  %s58_s8, 1024, %s60_s18, [#allocation3], %s1797_s30, %s1797_s30, %s1798_s2  }
  0x1e   :  { %93 = dma.hbm_to_vmem [thread:$0]  %s86_s6, 1024, %s88_s3, [#allocation6], %s1797_s30, %s1797_s30, %s1798_s2  }
  0x1f   :  { %s1803_s27 = smov [#allocation10]   ;;  %s147_s0 = sshll.u32 %s2261_s20, 4  ;;  %s148_s0 = int_to_ptr.hbm [resolvable:$true] %s147_s0 }
  0x20   :  { %s121_s11 = sshll.u32 %s1803_s27, 4  ;;  %s1804_s17 = smov [#allocation13]   ;;  %s122_s11 = int_to_ptr.vmem [resolvable:$true] %s121_s11 }
  0x21   :  { %127 = dma.hbm_to_vmem [thread:$0]  %s120_s1, 1024, %s122_s11, [#allocation9], %s1797_s30, %s1797_s30, %s1798_s2  }
  0x22   :  { %s149_s8 = sshll.u32 %s1804_s17, 4  ;;  %s150_s8 = int_to_ptr.vmem [resolvable:$true] %s149_s8 }
  0x23   :  { %155 = dma.hbm_to_vmem [thread:$0]  %s148_s0, 1024, %s150_s8, [#allocation12], %s1797_s30, %s1797_s30, %s1798_s2  }
  0x24   :  { %1786 = dma.done.wait [#allocation3], 1024  }
  0x25   :  { %1787 = vsyncadd [#allocation3], 4294966272 }
  0x26   :  { %1788 = dma.done.wait [#allocation6], 2048  }
  0x27   :  { %1789 = vsyncadd [#allocation6], 4294965248 }
  0x28   :  { %1790 = dma.done.wait [#allocation9], 2048  }
  0x29   :  { %1791 = vsyncadd [#allocation9], 4294965248 }
  0x2a   :  { %1792 = dma.done.wait [#allocation12], 2048  }
  0x2b   :  { %1793 = vsyncadd [#allocation12], 4294965248  ;;  %vm204_vm0 = vcmask 1043456   ;;  %vm205_vm1 = vcmask 1044480   ;;  %v1805_v0 = vmov 65535   ;;  %s2283_s18 = sld [smem:[#allocation24_spill]] }
  0x2c   :  { %v206_v1 = vsel %vm204_vm0, 4294967295, %v1805_v0  ;;  %s2284_s6 = sld [smem:[#allocation20_spill]]  ;;  %vm200_vm2 = vcmask 72704   ;;  %v1496_v11 = vld [vmem:[#allocation2 + $0x38] sm:$0xff]  ;;  %v1495_v13 = vld [vmem:[#allocation2 + $0x30] sm:$0xff]  ;;  %v1494_v15 = vld [vmem:[#allocation2 + $0x28] sm:$0xff] }
  0x2d   :  { %v207_v4 = vsel %vm205_vm1, %v206_v1, 0  ;;  %s2285_s1 = sld [smem:[#allocation26_spill]]  ;;  %v1504_v12 = vld [vmem:[#allocation5 + $0x38] sm:$0xff]  ;;  %407 = vmatpush.bf16.msra.mxu3 %v1496_v11  ;;  %v1503_v14 = vld [vmem:[#allocation5 + $0x30] sm:$0xff]  ;;  %v1502_v16 = vld [vmem:[#allocation5 + $0x28] sm:$0xff]  ;;  %vm246_vm3 = vcmask 261120  }
  0x2e   :  { %346 = vmatpush.bf16.msra.mxu2 %v1504_v12  ;;  %v1493_v17 = vld [vmem:[#allocation2 + $0x20] sm:$0xff]  ;;  %v1492_v19 = vld [vmem:[#allocation2 + $0x18] sm:$0xff]  ;;  %v1491_v21 = vld [vmem:[#allocation2 + $0x10] sm:$0xff]  ;;  %s2286_s7 = sld [smem:[#allocation25_spill]]  ;;  %s1806_s4 = smov [#allocation14]  }
  0x2f   :  { %v1501_v18 = vld [vmem:[#allocation5 + $0x20] sm:$0xff]  ;;  %v1500_v20 = vld [vmem:[#allocation5 + $0x18] sm:$0xff]  ;;  %v1499_v22 = vld [vmem:[#allocation5 + $0x10] sm:$0xff]  ;;  %s2287_s17 = sld [smem:[#allocation21_spill]]  ;;  %s1091_s5 = sshll.u32 %s1806_s4, 4  ;;  %s1092_s5 = int_to_ptr.vmem [resolvable:$true] %s1091_s5 }
  0x30   :  { %v1490_v24 = vld [vmem:[#allocation2 + $0x8] sm:$0xff]  ;;  %v1489_v27 = vld [vmem:[#allocation2] sm:$0xff]  ;;  %v1512_v34 = vld [vmem:[#allocation7 + $0x38] sm:$0xff]  ;;  %s2288_s27 = sld [smem:[#allocation27_spill]] }
  0x31   :  { %v1122_v2 = vld [vmem:[%s2283_s18] sm:$0xf]  ;;  %v1486_v3 = vld [vmem:[%s2283_s18] sm:$0x10]  ;;  %408 = vmatpush.bf16.msra.mxu3 %v1495_v13  ;;  %v1498_v32 = vld [vmem:[#allocation5 + $0x8] sm:$0xff]  ;;  %494 = vmatpush.bf16.msra.mxu0 %v1512_v34  ;;  %s2289_s16 = sld [smem:[#allocation30_spill]] }
  0x32   :  { %v1123_v5 = vor.u32 %v1486_v3, %v1122_v2  ;;  %v187_v6 = vld [vmem:[%s2284_s6] sm:$0xff]  ;;  %347 = vmatpush.bf16.msra.mxu2 %v1503_v14  ;;  %v1352_v35 = vld [vmem:[%s2254_s13 + $0x70] sm:$0xf]  ;;  %v1528_v36 = vld [vmem:[%s2254_s13 + $0x74] sm:$0xf0]  ;;  %s2291_s29 = sld [smem:[#allocation22_spill]] }
  0x33   :  { %v1488_v7 = vld [vmem:[%s2285_s1 + $0x8] sm:$0xff]  ;;  %v188_v9 = vpack.c.bf16 %v187_v6, %v187_v6  ;;  %v1487_v10 = vld [vmem:[%s2285_s1] sm:$0xff]  ;;  %v1511_v38 = vld [vmem:[#allocation7 + $0x30] sm:$0xff]  ;;  %v1353_v39 = vor.u32 %v1528_v36, %v1352_v35  ;;  %s1093_s6 = sshll.u32 %s2264_s23, 4  ;;  %s1094_s6 = int_to_ptr.hbm [resolvable:$true] %s1093_s6 }
  0x34   :  { %v209_v8 = vand.u32 %v1123_v5, %v207_v4  ;;  %v1588_v23 = vld [vmem:[%s2286_s7] ss:$0 sm:$0xff]  ;;  %v1526_v40 = vld [vmem:[%s2254_s13 + $0x64] sm:$0xf0]  ;;  %v1288_v41 = vld [vmem:[%s2255_s14 + $0x70] sm:$0xf] }
  0x35   :  { %409 = vmatpush.bf16.msra.mxu3 %v1494_v15  ;;  %v2005_v30 = vld [vmem:[%s2287_s17] sm:$0xf]  ;;  %v1544_v42 = vld [vmem:[%s2255_s14 + $0x74] sm:$0xf0]  ;;  %v1543_v43 = vld [vmem:[%s2255_s14 + $0x74] sm:$0xf]  ;;  %495 = vmatpush.bf16.msra.mxu0 %v1511_v38 }
  0x36   :  { %218 = vmatpush.bf16.msra.mxu1 %v209_v8  ;;  %348 = vmatpush.bf16.msra.mxu2 %v1502_v16  ;;  %v1497_v33 = vld [vmem:[#allocation5] sm:$0xff]  ;;  %v1290_v44 = vld [vmem:[%s2255_s14 + $0x78] sm:$0xf0]  ;;  %v1289_v46 = vor.u32 %v1544_v42, %v1288_v41  ;;  %v1336_v48 = vld [vmem:[%s2254_s13 + $0x50] sm:$0xf] }
  0x37   :  { %v1344_v37 = vld [vmem:[%s2254_s13 + $0x60] sm:$0xf]  ;;  %v1293_v47 = vor.u32 %v1543_v43, %v1290_v44  ;;  %v1524_v49 = vld [vmem:[%s2254_s13 + $0x54] sm:$0xf0]  ;;  %v1542_v51 = vld [vmem:[%s2255_s14 + $0x64] sm:$0xf0] }
  0x38   :  { %v1345_v45 = vor.u32 %v1526_v40, %v1344_v37  ;;  %v1280_v50 = vld [vmem:[%s2255_s14 + $0x60] sm:$0xf]  ;;  %v1541_v52 = vld [vmem:[%s2255_s14 + $0x64] sm:$0xf]  ;;  %v1510_v53 = vld [vmem:[#allocation7 + $0x28] sm:$0xff]  ;;  %v1337_v59 = vor.u32 %v1524_v49, %v1336_v48 }
  0x39   :  { %1124 = vmatmul.msk.bf16.vlgmr.msra.gmra.mxu1 %vm200_vm2, %v188_v9  ;;  %410 = vmatpush.bf16.msra.mxu3 %v1493_v17  ;;  %v1281_v54 = vor.u32 %v1542_v51, %v1280_v50  ;;  %v1282_v55 = vld [vmem:[%s2255_s14 + $0x68] sm:$0xf0]  ;;  %v1272_v57 = vld [vmem:[%s2255_s14 + $0x50] sm:$0xf]  ;;  %v1540_v58 = vld [vmem:[%s2255_s14 + $0x54] sm:$0xf0] }
  0x3a   :  { %256 = vmatpush.bf16.msrb.mxu1 %v1488_v7  ;;  %349 = vmatpush.bf16.msra.mxu2 %v1501_v18  ;;  %v1285_v56 = vor.u32 %v1541_v52, %v1282_v55  ;;  %v1539_v60 = vld [vmem:[%s2255_s14 + $0x54] sm:$0xf]  ;;  %v1274_v61 = vld [vmem:[%s2255_s14 + $0x58] sm:$0xf0]  ;;  %v1328_v62 = vld [vmem:[%s2254_s13 + $0x40] sm:$0xf]  ;;  %v1273_v1 = vor.u32 %v1540_v58, %v1272_v57 }
  0x3b   :  { %v1522_v63 = vld [vmem:[%s2254_s13 + $0x44] sm:$0xf0]  ;;  %496 = vmatpush.bf16.msra.mxu0 %v1510_v53  ;;  %v1509_v0 = vld [vmem:[#allocation7 + $0x20] sm:$0xff]  ;;  %v1277_v2 = vor.u32 %v1539_v60, %v1274_v61  ;;  %v1266_v7 = vld [vmem:[%s2255_s14 + $0x48] sm:$0xf0] }
  0x3c   :  { %v1264_v3 = vld [vmem:[%s2255_s14 + $0x40] sm:$0xf]  ;;  %v1538_v4 = vld [vmem:[%s2255_s14 + $0x44] sm:$0xf0]  ;;  %v1329_v5 = vor.u32 %v1522_v63, %v1328_v62  ;;  %v1537_v6 = vld [vmem:[%s2255_s14 + $0x44] sm:$0xf] }
  0x3d   :  { %411 = vmatpush.bf16.msra.mxu3 %v1492_v19  ;;  %v1320_v8 = vld [vmem:[%s2254_s13 + $0x30] sm:$0xf]  ;;  %v1520_v9 = vld [vmem:[%s2254_s13 + $0x34] sm:$0xf0]  ;;  %v1265_v11 = vor.u32 %v1538_v4, %v1264_v3  ;;  %v1269_v12 = vor.u32 %v1537_v6, %v1266_v7  ;;  %v1535_v16 = vld [vmem:[%s2255_s14 + $0x34] sm:$0xf] }
  0x3e   :  { %257 = vmatpush.bf16.msrb.mxu1 %v1487_v10  ;;  %350 = vmatpush.bf16.msra.mxu2 %v1500_v20  ;;  %v1508_v10 = vld [vmem:[#allocation7 + $0x18] sm:$0xff]  ;;  %v1256_v13 = vld [vmem:[%s2255_s14 + $0x30] sm:$0xf]  ;;  %v1321_v15 = vor.u32 %v1520_v9, %v1320_v8  ;;  %v1312_v18 = vld [vmem:[%s2254_s13 + $0x20] sm:$0xf] }
  0x3f   :  { %497 = vmatpush.bf16.msra.mxu0 %v1509_v0  ;;  %v1536_v14 = vld [vmem:[%s2255_s14 + $0x34] sm:$0xf0]  ;;  %v1258_v17 = vld [vmem:[%s2255_s14 + $0x38] sm:$0xf0]  ;;  %v1518_v19 = vld [vmem:[%s2254_s13 + $0x24] sm:$0xf0] }
  0x40   :  { %v1507_v20 = vld [vmem:[#allocation7 + $0x10] sm:$0xff]  ;;  %v1354_v37 = vld [vmem:[%s2254_s13 + $0x78] sm:$0xf0]  ;;  %v1296_v40 = vld [vmem:[%s2254_s13] sm:$0xf] }
  0x41   :  { %412 = vmatpush.bf16.msra.mxu3 %v1491_v21  ;;  %v1257_v21 = vor.u32 %v1536_v14, %v1256_v13  ;;  %v1527_v36 = vld [vmem:[%s2254_s13 + $0x74] sm:$0xf]  ;;  %v1514_v41 = vld [vmem:[%s2254_s13 + $0x4] sm:$0xf0]  ;;  %v1505_v42 = vld [vmem:[#allocation7] sm:$0xff] }
  0x42   :  { %351 = vmatpush.bf16.msra.mxu2 %v1499_v22  ;;  %620 = vmatpush.bf16.msra.mxu1 %v1289_v46  ;;  %v1261_v22 = vor.u32 %v1535_v16, %v1258_v17  ;;  %v1357_v44 = vor.u32 %v1527_v36, %v1354_v37  ;;  %v1346_v46 = vld [vmem:[%s2254_s13 + $0x68] sm:$0xf0]  ;;  %v1240_v53 = vld [vmem:[%s2255_s14 + $0x10] sm:$0xf]  ;;  %v1531_v55 = vld [vmem:[%s2255_s14 + $0x14] sm:$0xf] }
  0x43   :  { %498 = vmatpush.bf16.msra.mxu0 %v1508_v10  ;;  %v1242_v57 = vld [vmem:[%s2255_s14 + $0x18] sm:$0xf0]  ;;  %v1523_v58 = vld [vmem:[%s2254_s13 + $0x54] sm:$0xf]  ;;  %v1232_v62 = vld [vmem:[%s2255_s14] sm:$0xf] }
  0x44   :  { %v1245_v60 = vor.u32 %v1531_v55, %v1242_v57  ;;  %v1530_v63 = vld [vmem:[%s2255_s14 + $0x4] sm:$0xf0]  ;;  %v1521_v3 = vld [vmem:[%s2254_s13 + $0x44] sm:$0xf]  ;;  %v1519_v7 = vld [vmem:[%s2254_s13 + $0x34] sm:$0xf] }
  0x45   :  { %413 = vmatpush.bf16.msra.mxu3 %v1490_v24  ;;  %v1534_v24 = vld [vmem:[%s2255_s14 + $0x24] sm:$0xf0]  ;;  %v1233_v0 = vor.u32 %v1530_v63, %v1232_v62  ;;  %v1322_v8 = vld [vmem:[%s2254_s13 + $0x38] sm:$0xf0]  ;;  %v1517_v10 = vld [vmem:[%s2254_s13 + $0x24] sm:$0xf] }
  0x46   :  { %352 = vmatpush.bf16.msra.mxu2 %v1498_v32  ;;  %621 = vmatpush.bf16.msra.mxu1 %v1281_v54  ;;  %v1506_v32 = vld [vmem:[#allocation7 + $0x8] sm:$0xff]  ;;  %v1532_v54 = vld [vmem:[%s2255_s14 + $0x14] sm:$0xf0]  ;;  %v1325_v9 = vor.u32 %v1519_v7, %v1322_v8  ;;  %v1515_v13 = vld [vmem:[%s2254_s13 + $0x14] sm:$0xf] }
  0x47   :  { %499 = vmatpush.bf16.msra.mxu0 %v1507_v20  ;;  %v1306_v14 = vld [vmem:[%s2254_s13 + $0x18] sm:$0xf0]  ;;  %v1513_v16 = vld [vmem:[%s2254_s13 + $0x4] sm:$0xf]  ;;  %v1298_v17 = vld [vmem:[%s2254_s13 + $0x8] sm:$0xf0] }
  0x48   :  { %v1568_v20 = vld [vmem:[#allocation11 + $0x38] sm:$0xff]  ;;  %v1570_v55 = vld [vmem:[#allocation13 + $0x8] sm:$0xff]  ;;  %v1591_v62 = vld [vmem:[%s2253_s12] ss:$0 sm:$0xff] }
  0x49   :  { %414 = vmatpush.bf16.msra.mxu3 %v1489_v27  ;;  %v1250_v27 = vld [vmem:[%s2255_s14 + $0x28] sm:$0xf0]  ;;  %v1548_v36 = vld [vmem:[#allocation8 + $0x18] sm:$0xff] }
  0x4a   :  { %353 = vmatpush.bf16.msra.mxu2 %v1497_v33  ;;  %622 = vmatpush.bf16.msra.mxu1 %v1273_v1  ;;  %v1529_v1 = vld [vmem:[%s2255_s14 + $0x4] sm:$0xf]  ;;  %v1554_v57 = vld [vmem:[#allocation10 + $0x8] sm:$0xff] }
  0x4b   :  { %500 = vmatpush.bf16.msra.mxu0 %v1506_v32  ;;  %v1565_v32 = vld [vmem:[#allocation11 + $0x20] sm:$0xff] }
  0x4c   :  { %415 = vmatmul.bf16.vlgmr.msra.gmra.mxu3 %v2005_v30 }
  0x4d   :  { %726 = vmatpush.bf16.msrb.mxu3 %v1353_v39 }
  0x4e   :  { %633 = vmatpush.bf16.msrb.mxu2 %v1293_v47  ;;  %623 = vmatpush.bf16.msra.mxu1 %v1265_v11  ;;  %v1297_v47 = vor.u32 %v1514_v41, %v1296_v40  ;;  %v1314_v11 = vld [vmem:[%s2254_s13 + $0x28] sm:$0xf0] }
  0x4f   :  { %501 = vmatpush.bf16.msra.mxu0 %v1505_v42  ;;  %v1574_v40 = vld [vmem:[#allocation13 + $0x28] sm:$0xff] }
  0x50   :  { %v1546_v41 = vld [vmem:[#allocation8 + $0x8] sm:$0xff] }
  0x51   :  { %727 = vmatpush.bf16.msrb.mxu3 %v1345_v45  ;;  %v1525_v45 = vld [vmem:[%s2254_s13 + $0x64] sm:$0xf]  ;;  %v1558_v42 = vld [vmem:[#allocation10 + $0x28] sm:$0xff] }
  0x52   :  { %634 = vmatpush.bf16.msrb.mxu2 %v1285_v56  ;;  %624 = vmatpush.bf16.msra.mxu1 %v1257_v21  ;;  %v1349_v49 = vor.u32 %v1525_v45, %v1346_v46  ;;  %v1241_v56 = vor.u32 %v1532_v54, %v1240_v53  ;;  %v1551_v21 = vld [vmem:[#allocation8 + $0x30] sm:$0xff]  ;;  %v1573_v45 = vld [vmem:[#allocation13 + $0x20] sm:$0xff] }
  0x53   :  { %739 = vmatpush.bf16.msrb.mxu0 %v1357_v44  ;;  %v1545_v46 = vld [vmem:[#allocation8] sm:$0xff] }
  0x54   :  { %v1561_v54 = vld [vmem:[#allocation11] sm:$0xff] }
  0x55   :  { %728 = vmatpush.bf16.msrb.mxu3 %v1337_v59  ;;  %v1338_v59 = vld [vmem:[%s2254_s13 + $0x58] sm:$0xf0] }
  0x56   :  { %635 = vmatpush.bf16.msrb.mxu2 %v1277_v2  ;;  %v1341_v61 = vor.u32 %v1523_v58, %v1338_v59  ;;  %v1234_v2 = vld [vmem:[%s2255_s14 + $0x8] sm:$0xf0]  ;;  %v1569_v58 = vld [vmem:[#allocation13] sm:$0xff] }
  0x57   :  { %740 = vmatpush.bf16.msrb.mxu0 %v1349_v49  ;;  %v1237_v4 = vor.u32 %v1529_v1, %v1234_v2  ;;  %v1572_v49 = vld [vmem:[#allocation13 + $0x18] sm:$0xff]  ;;  %v1553_v59 = vld [vmem:[#allocation10] sm:$0xff] }
  0x59   :  { %729 = vmatpush.bf16.msrb.mxu3 %v1329_v5  ;;  %v1330_v5 = vld [vmem:[%s2254_s13 + $0x48] sm:$0xf0] }
  0x5a   :  { %636 = vmatpush.bf16.msrb.mxu2 %v1269_v12  ;;  %v1333_v6 = vor.u32 %v1521_v3, %v1330_v5  ;;  %v1317_v12 = vor.u32 %v1517_v10, %v1314_v11 }
  0x5b   :  { %741 = vmatpush.bf16.msrb.mxu0 %v1341_v61  ;;  %v752_v61 = vld [vmem:[%s2256_s15] sm:$0x3] }
  0x5c   :  { %v754_v63 = vperm.slane %v752_v61, 0  ;;  %v755_v10 = vperm.slane %v752_v61, 1 }
  0x5d   :  { %730 = vmatpush.bf16.msrb.mxu3 %v1321_v15  ;;  %v1309_v15 = vor.u32 %v1515_v13, %v1306_v14 }
  0x5e   :  { %637 = vmatpush.bf16.msrb.mxu2 %v1261_v22  ;;  %v1560_v22 = vld [vmem:[#allocation10 + $0x38] sm:$0xff] }
  0x5f   :  { %742 = vmatpush.bf16.msrb.mxu0 %v1333_v6 }
  0x63   :  { %743 = vmatpush.bf16.msrb.mxu0 %v1325_v9 }
  0x67   :  { %744 = vmatpush.bf16.msrb.mxu0 %v1317_v12 }
  0x6b   :  { %745 = vmatpush.bf16.msrb.mxu0 %v1309_v15 }
  0xb6   :  { %v220_v25 = vpop.f32.mrf.mxu1 }
  0xb7   :  { %v221_v26 = vadd.f32 %v1588_v23, %v220_v25  ;;  %v1248_v23 = vld [vmem:[%s2255_s14 + $0x20] sm:$0xf]  ;;  %v1313_v25 = vor.u32 %v1518_v19, %v1312_v18  ;;  %v1301_v18 = vor.u32 %v1513_v16, %v1298_v17  ;;  %v1552_v19 = vld [vmem:[#allocation8 + $0x38] sm:$0xff] }
  0xb8   :  { %v1249_v33 = vor.u32 %v1534_v24, %v1248_v23  ;;  %v1567_v23 = vld [vmem:[#allocation11 + $0x30] sm:$0xff]  ;;  %v1593_v16 = vld [vmem:[%s2262_s21] ss:$0 sm:$0xff] }
  0xb9   :  { %v224_v28 = vmax.f32 %v221_v26, 0.0  ;;  %v1533_v26 = vld [vmem:[%s2255_s14 + $0x24] sm:$0xf]  ;;  %731 = vmatpush.bf16.msrb.mxu3 %v1313_v25  ;;  %746 = vmatpush.bf16.msrb.mxu0 %v1301_v18  ;;  %v1559_v24 = vld [vmem:[#allocation10 + $0x30] sm:$0xff]  ;;  %v1550_v25 = vld [vmem:[#allocation8 + $0x28] sm:$0xff] }
  0xba   :  { %v1253_v34 = vor.u32 %v1533_v26, %v1250_v27  ;;  %625 = vmatpush.bf16.msra.mxu1 %v1249_v33  ;;  %v1566_v26 = vld [vmem:[#allocation11 + $0x28] sm:$0xff]  ;;  %v1590_v27 = vld [vmem:[%s2289_s16] ss:$0 sm:$0xff] }
  0xbb   :  { %v225_v29 = vpack.c.bf16 %v224_v28, %v224_v28  ;;  %v1589_v28 = vld [vmem:[%s2288_s27] ss:$0 sm:$0xff]  ;;  %s2290_s27 = sld [smem:[#allocation23_spill]] }
  0xbc   :  { %638 = vmatpush.bf16.msrb.mxu2 %v1253_v34  ;;  %v1576_v34 = vld [vmem:[#allocation13 + $0x38] sm:$0xff]  ;;  %v1592_v17 = vld [vmem:[%s2260_s19] ss:$0 sm:$0xff] }
  0xbd   :  { %1133 = vmatmul.msk.bf16.vlgmr.msrb.gmra.mxu1 %vm246_vm3, %v225_v29  ;;  %v1304_v29 = vld [vmem:[%s2254_s13 + $0x10] sm:$0xf] }
  0xbe   :  { %v222_v31 = vpop.f32.mrf.mxu1  ;;  %626 = vmatpush.bf16.msra.mxu1 %v1241_v56 }
  0xbf   :  { %v1516_v31 = vld [vmem:[%s2254_s13 + $0x14] sm:$0xf0] }
  0xc0   :  { %v1305_v38 = vor.u32 %v1516_v31, %v1304_v29  ;;  %639 = vmatpush.bf16.msrb.mxu2 %v1245_v60  ;;  %v1549_v31 = vld [vmem:[#allocation8 + $0x20] sm:$0xff] }
  0xc1   :  { %v918_v56 = vld [vmem:[%s2290_s27] sm:$0xf] }
  0xc2   :  { %732 = vmatpush.bf16.msrb.mxu3 %v1305_v38  ;;  %627 = vmatpush.bf16.msra.mxu1 %v1233_v0  ;;  %v1575_v38 = vld [vmem:[#allocation13 + $0x30] sm:$0xff]  ;;  %v1001_v60 = vld [vmem:[%s2291_s29] sm:$0xf] }
  0xc4   :  { %640 = vmatpush.bf16.msrb.mxu2 %v1237_v4 }
  0xc6   :  { %733 = vmatpush.bf16.msrb.mxu3 %v1297_v47  ;;  %826 = vmatpush.bf16.msrb.mxu1 %v1552_v19  ;;  %v1557_v47 = vld [vmem:[#allocation10 + $0x20] sm:$0xff] }
  0xc9   :  { %734 = vmatmul.bf16.vlgmr.msrb.gmra.mxu3 %v2005_v30 }
  0xca   :  { %987 = vmatpush.bf16.msra.mxu3 %v1568_v20  ;;  %827 = vmatpush.bf16.msrb.mxu1 %v1551_v21 }
  0xce   :  { %988 = vmatpush.bf16.msra.mxu3 %v1567_v23  ;;  %828 = vmatpush.bf16.msrb.mxu1 %v1550_v25 }
  0xcf   :  { %v416_v51 = vpop.f32.mrf.mxu3 }
  0xd2   :  { %989 = vmatpush.bf16.msra.mxu3 %v1566_v26  ;;  %829 = vmatpush.bf16.msrb.mxu1 %v1549_v31 }
  0xd6   :  { %990 = vmatpush.bf16.msra.mxu3 %v1565_v32  ;;  %830 = vmatpush.bf16.msrb.mxu1 %v1548_v36 }
  0xd7   :  { %v418_v52 = vpop.f32.mrf.mxu3 }
  0xd8   :  { %v1555_v52 = vld [vmem:[#allocation10 + $0x10] sm:$0xff] }
 0x13a   :  { %v259_v35 = vpop.f32.mrf.mxu1 }
 0x13b   :  { %v260_v39 = vadd.f32 %v1589_v28, %v259_v35 }
 0x13d   :  { %v263_v43 = vmax.f32 %v260_v39, 0.0  ;;  %v1547_v39 = vld [vmem:[#allocation8 + $0x10] sm:$0xff] }
 0x13e   :  { %831 = vmatpush.bf16.msrb.mxu1 %v1547_v39 }
 0x13f   :  { %v281_v48 = vpack.c.bf16 %v263_v43, %v263_v43  ;;  %v1564_v43 = vld [vmem:[#allocation11 + $0x18] sm:$0xff] }
 0x140   :  { %991 = vmatpush.bf16.msra.mxu3 %v1564_v43 }
 0x141   :  { %354 = vmatmul.bf16.vlgmr.msra.gmra.mxu2 %v281_v48  ;;  %v1563_v48 = vld [vmem:[#allocation11 + $0x10] sm:$0xff] }
 0x142   :  { %v261_v50 = vpop.f32.mrf.mxu1  ;;  %904 = vmatpush.bf16.msra.mxu2 %v1560_v22  ;;  %832 = vmatpush.bf16.msrb.mxu1 %v1546_v41 }
 0x143   :  { %v1556_v50 = vld [vmem:[#allocation10 + $0x18] sm:$0xff] }
 0x144   :  { %992 = vmatpush.bf16.msra.mxu3 %v1563_v48 }
 0x146   :  { %905 = vmatpush.bf16.msra.mxu2 %v1559_v24  ;;  %833 = vmatpush.bf16.msrb.mxu1 %v1545_v46 }
 0x14a   :  { %906 = vmatpush.bf16.msra.mxu2 %v1558_v42 }
 0x14c   :  { %v735_v44 = vpop.f32.mrf.mxu3 }
 0x14e   :  { %907 = vmatpush.bf16.msra.mxu2 %v1557_v47 }
 0x152   :  { %908 = vmatpush.bf16.msra.mxu2 %v1556_v50 }
 0x154   :  { %v737_v53 = vpop.f32.mrf.mxu3 }
 0x156   :  { %909 = vmatpush.bf16.msra.mxu2 %v1555_v52 }
 0x15a   :  { %910 = vmatpush.bf16.msra.mxu2 %v1554_v57 }
 0x15e   :  { %911 = vmatpush.bf16.msra.mxu2 %v1553_v59 }
 0x1c4   :  { %v355_v28 = vpop.f32.mrf.mxu2 }
 0x1c5   :  { %v417_v29 = vadd.f32 %v416_v51, %v355_v28  ;;  %v1562_v51 = vld [vmem:[#allocation11 + $0x8] sm:$0xff] }
 0x1c6   :  { %993 = vmatpush.bf16.msra.mxu3 %v1562_v51 }
 0x1c7   :  { %v424_v33 = vadd.f32 %v1590_v27, %v417_v29 }
 0x1c9   :  { %v425_v35 = vpack.c.bf16 %v424_v33, %v424_v33 }
 0x1ca   :  { %994 = vmatpush.bf16.msra.mxu3 %v1561_v54 }
 0x1cb   :  { %502 = vmatmul.bf16.vlgmr.msra.gmra.mxu0 %v425_v35  ;;  %628 = vmatmul.bf16.vlgmr.msra.gmra.mxu1 %v425_v35 }
 0x1cc   :  { %641 = vmatmul.bf16.vlgmr.msrb.gmra.mxu2 %v425_v35  ;;  %v357_v37 = vpop.f32.mrf.mxu2  ;;  %1070 = vmatpush.bf16.msra.mxu0 %v1576_v34 }
 0x1cd   :  { %995 = vmatmul.bf16.vlgmr.msra.gmra.mxu3 %v918_v56 }
 0x1d0   :  { %1071 = vmatpush.bf16.msra.mxu0 %v1575_v38 }
 0x1d4   :  { %1072 = vmatpush.bf16.msra.mxu0 %v1574_v40 }
 0x1d8   :  { %1073 = vmatpush.bf16.msra.mxu0 %v1573_v45 }
 0x1db   :  { %747 = vmatmul.bf16.vlgmr.msrb.gmra.mxu0 %v2005_v30  ;;  %v1571_v30 = vld [vmem:[#allocation13 + $0x10] sm:$0xff] }
 0x1dc   :  { %1074 = vmatpush.bf16.msra.mxu0 %v1572_v49 }
 0x1e0   :  { %1075 = vmatpush.bf16.msra.mxu0 %v1571_v30 }
 0x1e4   :  { %1076 = vmatpush.bf16.msra.mxu0 %v1570_v55 }
 0x1e8   :  { %1077 = vmatpush.bf16.msra.mxu0 %v1569_v58 }
 0x1eb   :  { %1078 = vmatmul.bf16.vlgmr.msra.gmra.mxu0 %v1001_v60 }
 0x248   :  { %v503_v0 = vpop.f32.mrf.mxu0  ;;  %v629_v1 = vpop.f32.mrf.mxu1 }
 0x249   :  { %v504_v2 = vadd.f32 %v1591_v62, %v503_v0  ;;  %v736_v3 = vadd.f32 %v735_v44, %v629_v1 }
 0x24b   :  { %507 = vst [vmem:[%s2263_s22] sm:$0xff] %v504_v2  ;;  %v758_v4 = vadd.f32 %v754_v63, %v736_v3 }
 0x24d   :  { %v760_v5 = vpack.c.bf16 %v758_v4, %v758_v4 }
 0x24f   :  { %v642_v6 = vpop.f32.mrf.mxu2  ;;  %834 = vmatmul.bf16.vlgmr.msrb.gmra.mxu1 %v760_v5 }
 0x250   :  { %v505_v7 = vpop.f32.mrf.mxu0  ;;  %v631_v8 = vpop.f32.mrf.mxu1 }
 0x251   :  { %v996_v19 = vpop.f32.mrf.mxu3 }
 0x252   :  { %v997_v21 = vadd.f32 %v1592_v17, %v996_v19 }
 0x254   :  { %1000 = vst [vmem:[%s2267_s26] sm:$0xff] %v997_v21 }
 0x257   :  { %v644_v9 = vpop.f32.mrf.mxu2 }
 0x258   :  { %v748_v11 = vpop.f32.mrf.mxu0 }
 0x259   :  { %v749_v12 = vadd.f32 %v748_v11, %v642_v6  ;;  %v998_v23 = vpop.f32.mrf.mxu3 }
 0x25b   :  { %v759_v13 = vadd.f32 %v755_v10, %v749_v12 }
 0x25d   :  { %v761_v14 = vpack.c.bf16 %v759_v13, %v759_v13 }
 0x25f   :  { %912 = vmatmul.bf16.vlgmr.msra.gmra.mxu2 %v761_v14 }
 0x260   :  { %v750_v15 = vpop.f32.mrf.mxu0 }
 0x268   :  { %v1079_v18 = vpop.f32.mrf.mxu0 }
 0x269   :  { %v1080_v20 = vadd.f32 %v1593_v16, %v1079_v18 }
 0x26b   :  { %1083 = vst [vmem:[#allocation14] sm:$0xff] %v1080_v20 }
 0x26c   :  { %1096 = dma.vmem_to_hbm [thread:$0]  %s1092_s5, 128, %s1094_s6, [#allocation4]  }
 0x270   :  { %v1081_v22 = vpop.f32.mrf.mxu0 }
 0x2cc   :  { %v835_v24 = vpop.f32.mrf.mxu1 }
 0x2cd   :  { %839 = vst [vmem:[%s2265_s24] sm:$0xff] %v835_v24 }
 0x2d4   :  { %v837_v25 = vpop.f32.mrf.mxu1 }
 0x2e2   :  { %v913_v26 = vpop.f32.mrf.mxu2 }
 0x2e3   :  { %917 = vst [vmem:[%s2266_s25] sm:$0xff] %v913_v26 }
 0x2ea   :  { %v915_v27 = vpop.f32.mrf.mxu2 }
 0x2eb   :  { %1794 = dma.done.wait [#allocation4], 128  }
 0x2ec   :  { %1795 = vsyncadd [#allocation4], 4294967168 }
 0x2ed   :  { %1115 = vsyncpa [#allocation3], 1 }
 0x2ee   :  { %1116 = vsyncpa [#allocation6], 1 }
 0x2ef   :  { %1117 = vsyncpa [#allocation9], 1 }
 0x2f0   :  { %1118 = vsyncpa [#allocation12], 1 }
 0x2f1   :  { %1119 = vsyncpa [#allocation4], 1 }

</bundles_post_ra>
